<compile_context>
chip_gen: v7x
topology: tpu7x:2x2x1
jax: 0.10.0
libtpu: 0.0.40
codegen_flags: <defaults>
</compile_context>

<pallas_src>
import math

import jax
import jax.numpy as jnp
from jax.experimental import pallas as pl
from jax.experimental.pallas import tpu as pltpu

_LANES = 128
_SUBLANES = 8
# ~24 MiB of double-buffered input blocks; fits (with headroom) under the
# 32 MiB scoped-VMEM limit we request explicitly below on all of v5e/v6e/v7x.
_VMEM_INPUT_BUDGET = 24 * 1024 * 1024
_VMEM_LIMIT_BYTES = 32 * 1024 * 1024


def _round_up(a, b):
    return ((a + b - 1) // b) * b


def _pick_tile_rows(rows, chunk_rows, itemsizes):
    """Rows per grid step, sized from the double-buffered VMEM input budget."""
    bytes_per_row = 2 * _LANES * sum(itemsizes)          # x2: double buffered
    t = (_VMEM_INPUT_BUDGET // bytes_per_row) // chunk_rows * chunk_rows
    t = max(chunk_rows, t)
    t = min(t, rows)
    # Prefer >= 2 grid steps so the "parallel" axis can be split across both
    # TensorCores on v7x (no-op on single-core v5e/v6e; one extra ~0.35us step).
    if t >= rows and rows >= 2 * chunk_rows:
        t = _round_up(pl.cdiv(rows, 2), chunk_rows)
    return t


def _make_dice_kernel(weighted, tile_rows, chunk_rows):
    """Partial-sums kernel.

    Streams (tile_rows, 128) blocks of each input in its native dtype, walks
    them in (chunk_rows, 128) chunks with a fori_loop (bounded live ranges, no
    full-tile f32 temporaries), masks rows past the end of the un-padded array
    (scalar-prefetched row count), and writes three (8, 128) f32 partial sums
    -- intersection, pred*mask, gt*mask -- into this grid step's output slot.
    """
    chunks = tile_rows // chunk_rows
    fold = chunk_rows // _SUBLANES

    def kernel(nrows_ref, *refs):
        if weighted:
            pred_ref, gt_ref, mask_ref, w_ref, out_ref = refs
        else:
            pred_ref, gt_ref, mask_ref, out_ref = refs
            w_ref = None

        valid_rows = nrows_ref[0]                      # rows actually backed by data
        row0 = pl.program_id(0) * tile_rows
        # Hoisted broadcast (JAX does not CSE broadcast_in_dim inside loops).
        row_iota = jax.lax.broadcasted_iota(jnp.int32, (chunk_rows, _LANES), 0)

        def body(c, carry):
            inter, psum, gsum = carry
            r = pl.multiple_of(c * chunk_rows, chunk_rows)
            sl = pl.ds(r, chunk_rows)
            p = pred_ref[sl, :].astype(jnp.float32)
            g = gt_ref[sl, :].astype(jnp.float32)
            m = mask_ref[sl, :].astype(jnp.float32)
            if weighted:
                m = m * w_ref[sl, :].astype(jnp.float32)
            # Rows at/after `valid_rows` were read past the end of the array by
            # the boundary grid block (garbage).  Zero p, g AND m so every
            # product term vanishes (a garbage NaN would survive a 0-multiply).
            rem = valid_rows - row0 - r                # scalar
            valid = row_iota < rem
            p = jnp.where(valid, p, 0.0)
            g = jnp.where(valid, g, 0.0)
            m = jnp.where(valid, m, 0.0)
            pm = p * m
            return (inter + pm * g, psum + pm, gsum + g * m)

        init = (jnp.zeros((chunk_rows, _LANES), jnp.float32),) * 3
        inter, psum, gsum = jax.lax.fori_loop(
            0, chunks, body, init, unroll=min(8, chunks))

        def fold_acc(a):
            if fold == 1:
                return a
            # (chunk_rows,128)->(fold,8,128): splits the sublane axis without
            # crossing (8,128) tiles; axis-0 reduce is plain vreg adds.
            return a.reshape(fold, _SUBLANES, _LANES).sum(axis=0)

        out_ref[0, 0] = fold_acc(inter)
        out_ref[0, 1] = fold_acc(psum)
        out_ref[0, 2] = fold_acc(gsum)

    return kernel


def _dice_sums(pred, gt, mask, weights=None):
    inputs = [pred, gt, mask]
    weighted = weights is not None
    if weighted:
        inputs.append(weights)

    # Chunk rows: multiple of every input's native sublane tiling (f32:8,
    # bf16:16, int8:32) so in-kernel dynamic slices never cross packing tiles.
    min_itemsize = min(x.dtype.itemsize for x in inputs)
    chunk_rows = _SUBLANES * max(1, 4 // min_itemsize)

    total = math.prod(pred.shape)
    # Flatten in native dtype.  The (rows, 128) reshape is free when `total`
    # is already a multiple of chunk_rows*128; otherwise a single small
    # zero-pad is emitted (zeros contribute 0 to every sum).  Tile-level
    # raggedness (rows % tile != 0) is handled in-kernel -- no pad-to-tile.
    padded_total = _round_up(total, chunk_rows * _LANES)
    rows = padded_total // _LANES

    def prep(x):
        x = x.reshape(-1)
        if x.shape[0] != padded_total:
            # TODO(synk): a fully copy-free ragged path would need 1-D blocks
            # plus lane-level masking; this pad is only to the next
            # chunk_rows*128 elements and only triggers for ragged sizes.
            x = jnp.pad(x, (0, padded_total - x.shape[0]))
        return x.reshape(rows, _LANES)

    inputs = [prep(x) for x in inputs]

    tile_r = _pick_tile_rows(rows, chunk_rows,
                             [x.dtype.itemsize for x in inputs])
    grid = pl.cdiv(rows, tile_r)          # last block's tail masked in-kernel

    nrows = jnp.array([rows], dtype=jnp.int32)   # scalar prefetch (SMEM)

    in_spec = pl.BlockSpec((tile_r, _LANES), lambda i, nr: (i, 0))
    out_spec = pl.BlockSpec((1, 3, _SUBLANES, _LANES), lambda i, nr: (i, 0, 0, 0))

    partials = pl.pallas_call(
        _make_dice_kernel(weighted, tile_r, chunk_rows),
        grid_spec=pltpu.PrefetchScalarGridSpec(
            num_scalar_prefetch=1,
            grid=(grid,),
            in_specs=[in_spec] * len(inputs),
            out_specs=out_spec,
        ),
        out_shape=jax.ShapeDtypeStruct((grid, 3, _SUBLANES, _LANES), jnp.float32),
        compiler_params=pltpu.CompilerParams(
            dimension_semantics=("parallel",),   # independent tiles -> megacore ok
            vmem_limit_bytes=_VMEM_LIMIT_BYTES,
        ),
    )(nrows, *inputs)

    # Tiny (grid, 3, 8, 128) partials -> three scalars in plain JAX glue.
    sums = partials.sum(axis=(0, 2, 3))
    return sums[0], sums[1], sums[2]


def dice_loss(pred, gt, mask, weights=None, eps=1e-6):
    """Matches DiceLoss.forward semantics.

    pred: (N, 1, H, W) or (N, H, W)
    gt:   same shape as pred
    mask: (N, H, W)
    weights: optional (N, H, W)
    Returns a float32 scalar.
    """
    if pred.ndim == 4:
        pred = pred[:, 0, :, :]
        gt = gt[:, 0, :, :]
    assert pred.shape == gt.shape
    assert pred.shape == mask.shape
    if weights is not None:
        assert weights.shape == mask.shape

    intersection, psum, gsum = _dice_sums(pred, gt, mask, weights)
    union = psum + gsum + jnp.float32(eps)
    loss = 1.0 - 2.0 * intersection / union
    # TODO(synk): the PyTorch `assert loss <= 1` is a device-value assert; it
    # is checked host-side in the harness below instead of inside the kernel.
    return loss


if __name__ == "__main__":
    key = jax.random.PRNGKey(0)
    k1, k2, k3, k4 = jax.random.split(key, 4)

    N, H, W = 2, 16, 16
    pred = jax.nn.sigmoid(jax.random.normal(k1, (N, 1, H, W), dtype=jnp.float32))
    gt = (jax.random.uniform(k2, (N, 1, H, W)) > 0.5).astype(jnp.float32)
    mask = (jax.random.uniform(k3, (N, H, W)) > 0.2).astype(jnp.float32)
    weights = jax.random.uniform(k4, (N, H, W), dtype=jnp.float32)

    loss = dice_loss(pred, gt, mask)
    loss_w = dice_loss(pred, gt, mask, weights=weights)
    jax.block_until_ready((loss, loss_w))

    # reference check (plain jnp)
    p = pred[:, 0]
    g = gt[:, 0]
    ref = 1.0 - 2.0 * jnp.sum(p * g * mask) / (
        jnp.sum(p * mask) + jnp.sum(g * mask) + 1e-6
    )
    mw = weights * mask
    ref_w = 1.0 - 2.0 * jnp.sum(p * g * mw) / (
        jnp.sum(p * mw) + jnp.sum(g * mw) + 1e-6
    )
    assert jnp.allclose(loss, ref, atol=1e-5), (loss, ref)
    assert jnp.allclose(loss_w, ref_w, atol=1e-5), (loss_w, ref_w)
    assert float(loss) <= 1.0
    assert float(loss_w) <= 1.0

    # native bf16 streaming path (no wrapper pre-cast; kernel casts per-chunk)
    loss_bf16 = dice_loss(
        pred.astype(jnp.bfloat16),
        gt.astype(jnp.bfloat16),
        mask.astype(jnp.bfloat16),
    )
    jax.block_until_ready(loss_bf16)
    assert jnp.allclose(loss_bf16, ref, atol=2e-2), (loss_bf16, ref)

    # ragged shape: 2*30*50 = 3000 elems -> 24 rows, tile 16, grid 2; the last
    # block over-runs the array and its garbage tail is masked in-kernel.
    Hr, Wr = 30, 50
    predr = jax.nn.sigmoid(jax.random.normal(k1, (N, 1, Hr, Wr), dtype=jnp.float32))
    gtr = (jax.random.uniform(k2, (N, 1, Hr, Wr)) > 0.5).astype(jnp.float32)
    maskr = (jax.random.uniform(k3, (N, Hr, Wr)) > 0.2).astype(jnp.float32)
    loss_r = dice_loss(predr, gtr, maskr)
    jax.block_until_ready(loss_r)
    pr = predr[:, 0]
    gr = gtr[:, 0]
    ref_r = 1.0 - 2.0 * jnp.sum(pr * gr * maskr) / (
        jnp.sum(pr * maskr) + jnp.sum(gr * maskr) + 1e-6
    )
    assert jnp.allclose(loss_r, ref_r, atol=1e-5), (loss_r, ref_r)
    assert float(loss_r) <= 1.0

    print("KERNEL_OK")
</pallas_src>

<mosaic_0001>
module attributes {stable_mosaic.version = 11 : i64} {
  func.func @kernel(%arg0: i32, %arg1: memref<1xi32, #tpu.memory_space<smem>>, %arg2: memref<8x128xf32, #tpu.memory_space<vmem>>, %arg3: memref<8x128xf32, #tpu.memory_space<vmem>>, %arg4: memref<8x128xf32, #tpu.memory_space<vmem>>, %arg5: memref<1x3x8x128xf32, #tpu.memory_space<vmem>>) attributes {dimension_semantics = [#tpu.dimension_semantics<parallel>], iteration_bounds = array<i64: 1>, scalar_prefetch = 1 : i64, scratch_operands = 0 : i64, tpu.core_type = #tpu.core_type<tc>, window_params = [{transform_indices = @transform_0, window_bounds = array<i64: 8, 128>}, {transform_indices = @transform_1, window_bounds = array<i64: 8, 128>}, {transform_indices = @transform_2, window_bounds = array<i64: 8, 128>}, {transform_indices = @transform_3, window_bounds = array<i64: 1, 3, 8, 128>}]} {
    %c0 = arith.constant 0 : index
    %0 = memref.load %arg1[%c0] : memref<1xi32, #tpu.memory_space<smem>>
    %c8_i32 = arith.constant 8 : i32
    %1 = arith.muli %arg0, %c8_i32 : i32
    %2 = tpu.iota {dimensions = array<i32: 0>} : vector<8x128xi32>
    %cst = arith.constant 0.000000e+00 : f32
    %3 = vector.broadcast %cst : f32 to vector<8x128xf32>
    %c0_i32 = arith.constant 0 : i32
    %c8_i32_0 = arith.constant 8 : i32
    %4 = arith.muli %c0_i32, %c8_i32_0 : i32
    %5 = tpu.assume_multiple %4, 8 : i32
    %6 = arith.index_cast %5 : i32 to index
    %c0_1 = arith.constant 0 : index
    %7 = vector.load %arg2[%6, %c0_1] : memref<8x128xf32, #tpu.memory_space<vmem>>, vector<8x128xf32>
    %8 = arith.index_cast %5 : i32 to index
    %c0_2 = arith.constant 0 : index
    %9 = vector.load %arg3[%8, %c0_2] : memref<8x128xf32, #tpu.memory_space<vmem>>, vector<8x128xf32>
    %10 = arith.index_cast %5 : i32 to index
    %c0_3 = arith.constant 0 : index
    %11 = vector.load %arg4[%10, %c0_3] : memref<8x128xf32, #tpu.memory_space<vmem>>, vector<8x128xf32>
    %12 = arith.subi %0, %1 : i32
    %13 = arith.subi %12, %5 : i32
    %14 = vector.broadcast %13 : i32 to vector<8x128xi32>
    %15 = arith.cmpi slt, %2, %14 : vector<8x128xi32>
    %cst_4 = arith.constant 0.000000e+00 : f32
    %16 = vector.broadcast %cst_4 : f32 to vector<8x128xf32>
    %17 = arith.select %15, %7, %16 : vector<8x128xi1>, vector<8x128xf32>
    %cst_5 = arith.constant 0.000000e+00 : f32
    %18 = vector.broadcast %cst_5 : f32 to vector<8x128xf32>
    %19 = arith.select %15, %9, %18 : vector<8x128xi1>, vector<8x128xf32>
    %cst_6 = arith.constant 0.000000e+00 : f32
    %20 = vector.broadcast %cst_6 : f32 to vector<8x128xf32>
    %21 = arith.select %15, %11, %20 : vector<8x128xi1>, vector<8x128xf32>
    %22 = arith.mulf %17, %21 : vector<8x128xf32>
    %23 = arith.mulf %22, %19 : vector<8x128xf32>
    %24 = arith.addf %3, %23 : vector<8x128xf32>
    %25 = arith.addf %3, %22 : vector<8x128xf32>
    %26 = arith.mulf %19, %21 : vector<8x128xf32>
    %27 = arith.addf %3, %26 : vector<8x128xf32>
    %c1_i32 = arith.constant 1 : i32
    %c0_7 = arith.constant 0 : index
    %c0_8 = arith.constant 0 : index
    %c0_9 = arith.constant 0 : index
    %c0_10 = arith.constant 0 : index
    %28 = vector.load %arg5[%c0_7, %c0_8, %c0_9, %c0_10] : memref<1x3x8x128xf32, #tpu.memory_space<vmem>>, vector<1x1x8x128xf32>
    %29 = vector.shape_cast %28 : vector<1x1x8x128xf32> to vector<8x128xf32>
    %30 = vector.shape_cast %24 : vector<8x128xf32> to vector<1x1x8x128xf32>
    tpu.vector_store %arg5[%c0_7, %c0_8, %c0_9, %c0_10], %30 {strides = array<i32>} : memref<1x3x8x128xf32, #tpu.memory_space<vmem>>, vector<1x1x8x128xf32>,
    %c0_11 = arith.constant 0 : index
    %c1 = arith.constant 1 : index
    %c0_12 = arith.constant 0 : index
    %c0_13 = arith.constant 0 : index
    %31 = vector.load %arg5[%c0_11, %c1, %c0_12, %c0_13] : memref<1x3x8x128xf32, #tpu.memory_space<vmem>>, vector<1x1x8x128xf32>
    %32 = vector.shape_cast %31 : vector<1x1x8x128xf32> to vector<8x128xf32>
    %33 = vector.shape_cast %25 : vector<8x128xf32> to vector<1x1x8x128xf32>
    tpu.vector_store %arg5[%c0_11, %c1, %c0_12, %c0_13], %33 {strides = array<i32>} : memref<1x3x8x128xf32, #tpu.memory_space<vmem>>, vector<1x1x8x128xf32>,
    %c0_14 = arith.constant 0 : index
    %c2 = arith.constant 2 : index
    %c0_15 = arith.constant 0 : index
    %c0_16 = arith.constant 0 : index
    %34 = vector.load %arg5[%c0_14, %c2, %c0_15, %c0_16] : memref<1x3x8x128xf32, #tpu.memory_space<vmem>>, vector<1x1x8x128xf32>
    %35 = vector.shape_cast %34 : vector<1x1x8x128xf32> to vector<8x128xf32>
    %36 = vector.shape_cast %27 : vector<8x128xf32> to vector<1x1x8x128xf32>
    tpu.vector_store %arg5[%c0_14, %c2, %c0_15, %c0_16], %36 {strides = array<i32>} : memref<1x3x8x128xf32, #tpu.memory_space<vmem>>, vector<1x1x8x128xf32>,
    return
  }
  func.func @transform_0(%arg0: i32, %arg1: memref<1xi32, #tpu.memory_space<smem>>) -> (i32, i32) {
    %c0_i32 = arith.constant 0 : i32
    %c0_i32_0 = arith.constant 0 : i32
    return %arg0, %c0_i32 : i32, i32
  }
  func.func @transform_1(%arg0: i32, %arg1: memref<1xi32, #tpu.memory_space<smem>>) -> (i32, i32) {
    %c0_i32 = arith.constant 0 : i32
    %c0_i32_0 = arith.constant 0 : i32
    return %arg0, %c0_i32 : i32, i32
  }
  func.func @transform_2(%arg0: i32, %arg1: memref<1xi32, #tpu.memory_space<smem>>) -> (i32, i32) {
    %c0_i32 = arith.constant 0 : i32
    %c0_i32_0 = arith.constant 0 : i32
    return %arg0, %c0_i32 : i32, i32
  }
  func.func @transform_3(%arg0: i32, %arg1: memref<1xi32, #tpu.memory_space<smem>>) -> (i32, i32, i32, i32) {
    %c0_i32 = arith.constant 0 : i32
    %c0_i32_0 = arith.constant 0 : i32
    %c0_i32_1 = arith.constant 0 : i32
    %c0_i32_2 = arith.constant 0 : i32
    return %arg0, %c0_i32, %c0_i32_0, %c0_i32_1 : i32, i32, i32, i32
  }
}

</mosaic_0001>

<bundles_post_ra>
// kernel: tpu_custom_call.1
= control target key start
LH: loop header
LB: loop body
LE: loop exit
PB: predicated region body
PF: predicated region fallthrough
CT: control target
= control target key end

     0   :  { %10 = vsyncpa [#allocation5], 0  ;;  %s233_s0 = inlined_call_operand.<no memory space> [shape: s32[1], index: 0, kind: input, shape index: {}]   ;;  %s234_s1 = inlined_call_operand.hbm [shape: f32[8,128], index: 1, kind: input, shape index: {}]   ;;  %s235_s2 = inlined_call_operand.hbm [shape: f32[8,128], index: 2, kind: input, shape index: {}]   ;;  %s236_s3 = inlined_call_operand.vmem [shape: f32[8,128], index: 3, kind: input, shape index: {}]   ;;  %s237_s4 = inlined_call_operand.hbm [shape: f32[1,3,8,128], index: 4, kind: output, shape index: {}]  }
   0x1   :  { %11 = vsyncpa [#allocation8], 0 }
   0x2   :  { %12 = vsyncpa [#allocation6], 0  ;;  %s161_s15 = smov [#allocation4]   ;;  %s162_s17 = smov [#allocation7]  }
   0x3   :  { %s19_s16 = sshll.u32 %s161_s15, 4  ;;  %s29_s18 = sshll.u32 %s162_s17, 4  ;;  %s20_s16 = int_to_ptr.vmem [resolvable:$true] %s19_s16  ;;  %s30_s18 = int_to_ptr.vmem [resolvable:$true] %s29_s18 }
   0x4   :  { %s89_s21 = scalar_lea.hbm %s234_s1, 128 }
   0x5   :  { %p90_p0 = scmp.ne.s32.totalorder %s234_s1, %s89_s21  ;;  %p93_p1 = scmp.lt.u32.totalorder %s89_s21, %s234_s1 }
   0x7   :  { %p95_p2 = pnand %p93_p1, %p90_p0 }
   0x9   :  { %98 = shalt.err (!%p95_p2)
}
   0xa   :  { %s99_s26 = scalar_lea.vmem %s20_s16, 128  ;;  %p104_p4 = scmp.lt.s32.totalorder %s20_s16, %s20_s16 }
   0xb   :  { %p100_p3 = scmp.ne.s32.totalorder %s20_s16, %s99_s26  ;;  %p105_p5 = scmp.lt.s32.totalorder %s99_s26, %s99_s26 }
   0xd   :  { %p106_p6 = por %p105_p5, %p104_p4 }
   0xf   :  { %p107_p7 = pnand %p106_p6, %p100_p3 }
  0x11   :  { %110 = shalt.err (!%p107_p7)
}
  0x12   :  { %22 = dma.hbm_to_vmem [thread:$0]  %s234_s1, 128, %s20_s16, [#allocation5]  }
  0x13   :  { %s111_s5 = scalar_lea.hbm %s235_s2, 128 }
  0x14   :  { %p112_p8 = scmp.ne.s32.totalorder %s235_s2, %s111_s5  ;;  %p115_p9 = scmp.lt.u32.totalorder %s111_s5, %s235_s2 }
  0x16   :  { %p117_p10 = pnand %p115_p9, %p112_p8 }
  0x18   :  { %120 = shalt.err (!%p117_p10)
}
  0x19   :  { %s121_s10 = scalar_lea.vmem %s30_s18, 128  ;;  %p126_p12 = scmp.lt.s32.totalorder %s30_s18, %s30_s18 }
  0x1a   :  { %p122_p11 = scmp.ne.s32.totalorder %s30_s18, %s121_s10  ;;  %p127_p13 = scmp.lt.s32.totalorder %s121_s10, %s121_s10 }
  0x1c   :  { %p128_p0 = por %p127_p13, %p126_p12 }
  0x1e   :  { %p129_p1 = pnand %p128_p0, %p122_p11 }
  0x20   :  { %132 = shalt.err (!%p129_p1)
}
  0x21   :  { %32 = dma.hbm_to_vmem [thread:$0]  %s235_s2, 128, %s30_s18, [#allocation8]  }
  0x22   :  { %155 = dma.done.wait [#allocation5], 128  }
  0x23   :  { %156 = vsyncadd [#allocation5], 4294967168 }
  0x24   :  { %157 = dma.done.wait [#allocation8], 128  }
  0x25   :  { %158 = vsyncadd [#allocation8], 4294967168  ;;  %v43_v0 = vlaneseq  ;;  %v50_v2 = vstv %s233_s0  ;;  %v45_v3 = vld [vmem:[#allocation4] sm:$0xff]  ;;  %v46_v4 = vld [vmem:[#allocation7] sm:$0xff]  ;;  %s163_s2 = smov [#allocation9]  }
  0x26   :  { %v47_v5 = vld [vmem:[%s236_s3] sm:$0xff]  ;;  %s71_s16 = sshll.u32 %s163_s2, 4  ;;  %s72_s16 = int_to_ptr.vmem [resolvable:$true] %s71_s16 }
  0x27   :  { %v44_v1 = vshrl.u32 %v43_v0, 7  ;;  %s133_s0 = scalar_lea.vmem %s72_s16, 384  ;;  %p138_p3 = scmp.lt.s32.totalorder %s72_s16, %s72_s16 }
  0x28   :  { %p134_p2 = scmp.ne.s32.totalorder %s72_s16, %s133_s0  ;;  %p139_p4 = scmp.lt.s32.totalorder %s133_s0, %s133_s0 }
  0x29   :  { %vm51_vm0 = vcmp.lt.s32.totalorder %v44_v1, %v50_v2 }
  0x2a   :  { %v52_v6 = vsel %vm51_vm0, %v45_v3, 0.0  ;;  %v53_v7 = vsel %vm51_vm0, %v46_v4, 0.0  ;;  %v54_v8 = vsel %vm51_vm0, %v47_v5, 0.0  ;;  %p140_p5 = por %p139_p4, %p138_p3 }
  0x2b   :  { %v55_v9 = vmul.f32 %v54_v8, %v52_v6  ;;  %v59_v10 = vmul.f32 %v54_v8, %v53_v7 }
  0x2c   :  { %p141_p6 = pnand %p140_p5, %p134_p2 }
  0x2d   :  { %v56_v11 = vmul.f32 %v55_v9, %v53_v7  ;;  %63 = vst [vmem:[#allocation9 + $0x8] sm:$0xff] %v55_v9  ;;  %65 = vst [vmem:[#allocation9 + $0x10] sm:$0xff] %v59_v10 }
  0x2f   :  { %61 = vst [vmem:[#allocation9] sm:$0xff] %v56_v11 }
  0x30   :  { %144 = shalt.err (!%p141_p6)
}
  0x31   :  { %s145_s18 = scalar_lea.hbm %s237_s4, 384 }
  0x32   :  { %p146_p7 = scmp.ne.s32.totalorder %s237_s4, %s145_s18  ;;  %p149_p8 = scmp.lt.u32.totalorder %s145_s18, %s237_s4 }
  0x34   :  { %p151_p9 = pnand %p149_p8, %p146_p7 }
  0x36   :  { %154 = shalt.err (!%p151_p9)
}
  0x37   :  { %s164_s23 = smov 128   ;;  %s165_s24 = smov 8  }
  0x38   :  { %77 = dma.vmem_to_hbm [thread:$0]  %s72_s16, 384, %s237_s4, [#allocation6], %s164_s23, %s164_s23, %s165_s24  }
  0x39   :  { %159 = dma.done.wait [#allocation6], 384  }
  0x3a   :  { %160 = vsyncadd [#allocation6], 4294966912 }
  0x3b   :  { %81 = vsyncpa [#allocation5], 1 }
  0x3c   :  { %82 = vsyncpa [#allocation8], 1 }
  0x3d   :  { %83 = vsyncpa [#allocation6], 1 }

</bundles_post_ra>
